<compile_context>
chip_gen: v7x
topology: tpu7x:2x2x1
jax: 0.10.0
libtpu: 0.0.40
codegen_flags: <defaults>
</compile_context>

<pallas_src>
import functools

import jax
import jax.numpy as jnp
from jax.experimental import pallas as pl
from jax.experimental.pallas import tpu as pltpu


def _round_up(x: int, m: int) -> int:
    return (x + m - 1) // m * m


# ---------------------------------------------------------------------------
# Kernels
# ---------------------------------------------------------------------------
def _linear_whole_kernel(x_ref, w_ref, b_ref, o_ref):
    # Fast path: whole arrays resident in VMEM, single invocation.
    # x_ref: (M, K), w_ref: (N, K) (PyTorch layout), b_ref: (1, N) f32.
    acc = jax.lax.dot_general(
        x_ref[...],
        w_ref[...],
        dimension_numbers=(((1,), (1,)), ((), ())),
        preferred_element_type=jnp.float32,
    )
    o_ref[...] = (acc + b_ref[...]).astype(o_ref.dtype)


def _linear_tiled_f32out_kernel(x_ref, w_ref, b_ref, o_ref):
    # f32 output: accumulate directly into the (resident-over-k) output block.
    # x_ref: (tm, tk), w_ref: (tk, tn), b_ref: (1, tn), o_ref: (tm, tn) f32.
    k = pl.program_id(2)

    @pl.when(k == 0)
    def _init():
        o_ref[...] = jnp.zeros_like(o_ref)

    o_ref[...] += jnp.dot(
        x_ref[...], w_ref[...], preferred_element_type=jnp.float32
    )

    @pl.when(k == pl.num_programs(2) - 1)
    def _finalize():
        o_ref[...] += b_ref[...]


def _linear_tiled_acc_kernel(x_ref, w_ref, b_ref, o_ref, acc_ref):
    # Low-precision output: keep an f32 VMEM accumulator.
    k = pl.program_id(2)

    @pl.when(k == 0)
    def _init():
        acc_ref[...] = jnp.zeros_like(acc_ref)

    acc_ref[...] += jnp.dot(
        x_ref[...], w_ref[...], preferred_element_type=jnp.float32
    )

    @pl.when(k == pl.num_programs(2) - 1)
    def _finalize():
        o_ref[...] = (acc_ref[...] + b_ref[...]).astype(o_ref.dtype)


# ---------------------------------------------------------------------------
# Wrapper
# ---------------------------------------------------------------------------
def subnet_forward(
    x,
    weight,
    bias,
    *,
    tm=512,
    tn=512,
    tk=1024,
    mxu_dtype=jnp.bfloat16,
    use_fast_path=None,
):
    """Equivalent of SubNet.forward: F.linear(x, weight, bias).

    x:      (..., K)
    weight: (N, K)   -- PyTorch nn.Linear layout
    bias:   (N,)

    mxu_dtype=jnp.bfloat16 (default) feeds the MXU at its native rate while
    accumulating in f32.  Pass mxu_dtype=None for exact-f32 matmul inputs.
    """
    *lead, K = x.shape
    N, Kw = weight.shape
    assert K == Kw, "in_features mismatch"

    x2 = x.reshape(-1, K)
    M = x2.shape[0]
    out_dtype = x.dtype
    osz = jnp.dtype(out_dtype).itemsize

    compute_dtype = jnp.dtype(mxu_dtype) if mxu_dtype is not None else jnp.dtype(x.dtype)
    csz = compute_dtype.itemsize

    if mxu_dtype is not None:
        x2 = x2.astype(mxu_dtype)
        weight = weight.astype(mxu_dtype)

    bias_f32 = bias.astype(jnp.float32).reshape(1, N)
    vmem = pltpu.MemorySpace.VMEM

    # ------------------------------------------------------------------
    # Fast path: whole problem comfortably fits in VMEM -> no padding,
    # no grid, no output slice.  (8,128) rule waived for full-array blocks.
    # ------------------------------------------------------------------
    fast_bytes = (M * K + N * K) * csz + (M + 1) * N * 4
    if use_fast_path is None:
        use_fast_path = (
            fast_bytes <= (2 << 20) and M <= 1024 and N <= 2048 and K <= 4096
        )

    if use_fast_path:
        out = pl.pallas_call(
            _linear_whole_kernel,
            out_shape=jax.ShapeDtypeStruct((M, N), out_dtype),
            in_specs=[
                pl.BlockSpec(memory_space=vmem),
                pl.BlockSpec(memory_space=vmem),
                pl.BlockSpec(memory_space=vmem),
            ],
            out_specs=pl.BlockSpec(memory_space=vmem),
        )(x2, weight, bias_f32)
        return out.reshape(*lead, N)

    # ------------------------------------------------------------------
    # Tiled path.
    # ------------------------------------------------------------------
    # One-time wrapper transpose to (K, N): canonical MXU contraction in the
    # kernel, no per-step relayout.  Fuses with the cast/pad in XLA.
    wt = weight.T  # (K, N)

    # dtype-aware sublane packing: f32 -> 8, bf16 -> 16, 8-bit -> 32.
    sub = {4: 8, 2: 16, 1: 32}.get(csz, 8)

    tm = min(tm, _round_up(M, sub))
    tk = min(tk, _round_up(K, 128))
    Nr = _round_up(N, 128)
    tn = min(tn, Nr)
    if Nr <= 2048:
        tn = Nr  # collapse j axis: weight streams exactly once per M tile

    Mp = _round_up(M, tm)
    Kp = _round_up(K, tk)
    # v7x megacore: if only one (i, j) tile would exist, split N so both
    # TensorCores get a "parallel" tile (near-zero impact on v5e/v6e).
    if Mp // tm == 1 and tn == Nr and Nr >= 256:
        tn = _round_up(Nr // 2, 128)
    Np = _round_up(N, tn)

    # Zero-pad only when needed (padding is exact for a matmul: extra K
    # contributes 0, extra M/N is sliced off).
    xp = (
        x2
        if (Mp == M and Kp == K)
        else jnp.zeros((Mp, Kp), x2.dtype).at[:M, :K].set(x2)
    )
    wp = (
        wt
        if (Kp == K and Np == N)
        else jnp.zeros((Kp, Np), wt.dtype).at[:K, :N].set(wt)
    )
    bp = (
        bias_f32
        if Np == N
        else jnp.zeros((1, Np), jnp.float32).at[:, :N].set(bias_f32)
    )

    grid = (Mp // tm, Np // tn, Kp // tk)
    i_tiles, j_tiles = grid[0], grid[1]

    f32_out = jnp.dtype(out_dtype) == jnp.dtype(jnp.float32)
    if f32_out:
        kernel = _linear_tiled_f32out_kernel
        scratch_shapes = []
    else:
        kernel = _linear_tiled_acc_kernel
        scratch_shapes = [pltpu.VMEM((tm, tn), jnp.float32)]

    # Per-step VMEM footprint (double-buffered in/out) -> explicit scoped
    # limit so v5e's 16 MiB default doesn't shrink pipelining; stays well
    # under v7x's 64 MiB physical VMEM.
    footprint = 2 * (tm * tk * csz + tk * tn * csz + tm * tn * osz) + 2 * tn * 4
    if not f32_out:
        footprint += tm * tn * 4
    vmem_limit = min(max(32 * 1024 * 1024, int(footprint * 1.75)), 48 * 1024 * 1024)

    # Honest HBM traffic: x is re-read once per N tile, weight once per M tile.
    cost = pl.CostEstimate(
        flops=2 * Mp * Np * Kp,
        transcendentals=0,
        bytes_accessed=(
            Mp * Kp * csz * j_tiles
            + Kp * Np * csz * i_tiles
            + Np * 4
            + Mp * Np * osz
        ),
    )

    out = pl.pallas_call(
        kernel,
        out_shape=jax.ShapeDtypeStruct((Mp, Np), out_dtype),
        grid_spec=pltpu.PrefetchScalarGridSpec(
            num_scalar_prefetch=0,
            grid=grid,
            in_specs=[
                pl.BlockSpec((tm, tk), lambda i, j, k: (i, k), memory_space=vmem),
                pl.BlockSpec((tk, tn), lambda i, j, k: (k, j), memory_space=vmem),
                pl.BlockSpec((1, tn), lambda i, j, k: (0, j), memory_space=vmem),
            ],
            out_specs=pl.BlockSpec(
                (tm, tn), lambda i, j, k: (i, j), memory_space=vmem
            ),
            scratch_shapes=scratch_shapes,
        ),
        compiler_params=pltpu.CompilerParams(
            dimension_semantics=("parallel", "parallel", "arbitrary"),
            vmem_limit_bytes=vmem_limit,
        ),
        cost_estimate=cost,
    )(xp, wp, bp)

    if Mp == M and Np == N:
        return out.reshape(*lead, N)
    return out[:M, :N].reshape(*lead, N)


if __name__ == "__main__":
    key = jax.random.PRNGKey(0)
    kx, kw, kx2, kw2 = jax.random.split(key, 4)

    # Shapes implied by the module: batch=2, seq=8, in_features=32, out_features=16.
    in_features, out_features = 32, 16
    x = jax.random.normal(kx, (2, 8, in_features), dtype=jnp.float32)
    weight = jax.random.normal(kw, (out_features, in_features), dtype=jnp.float32)
    bias = jnp.zeros((out_features,), dtype=jnp.float32)  # SubNet.__init__: zeros

    ref = jnp.einsum("bsk,nk->bsn", x, weight) + bias

    # 1) Exact-precision (f32 MXU inputs) on the toy shape -> whole-array fast path.
    y32 = jax.block_until_ready(
        jax.jit(functools.partial(subnet_forward, mxu_dtype=None))(x, weight, bias)
    )
    assert y32.shape == (2, 8, out_features)
    assert jnp.allclose(y32, ref, atol=1e-5, rtol=1e-5)

    # 2) Default path (bf16 MXU inputs, f32 accumulation) on the toy shape.
    ybf = jax.block_until_ready(jax.jit(subnet_forward)(x, weight, bias))
    assert ybf.shape == (2, 8, out_features)
    assert jnp.allclose(ybf, ref, atol=2e-1, rtol=5e-2)

    # 3) Tiled path (forced) on a larger shape, checked against a bf16-input /
    #    f32-accumulation reference.
    x2 = jax.random.normal(kx2, (2, 256, 512), dtype=jnp.float32)
    w2 = jax.random.normal(kw2, (384, 512), dtype=jnp.float32)
    b2 = jnp.zeros((384,), dtype=jnp.float32)
    y2 = jax.block_until_ready(
        jax.jit(functools.partial(subnet_forward, use_fast_path=False))(x2, w2, b2)
    )
    ref2 = (
        jnp.dot(
            x2.reshape(-1, 512).astype(jnp.bfloat16),
            w2.astype(jnp.bfloat16).T,
            preferred_element_type=jnp.float32,
        ).reshape(2, 256, 384)
        + b2
    )
    assert y2.shape == (2, 256, 384)
    assert jnp.allclose(y2, ref2, atol=1e-2, rtol=1e-2)

    print("KERNEL_OK")
</pallas_src>

<mosaic_0001>
module attributes {stable_mosaic.version = 11 : i64} {
  func.func @_linear_whole_kernel(%arg0: memref<16x32xf32, #tpu.memory_space<vmem>>, %arg1: memref<16x32xf32, #tpu.memory_space<vmem>>, %arg2: memref<1x16xf32, #tpu.memory_space<vmem>>, %arg3: memref<16x16xf32, #tpu.memory_space<vmem>>) attributes {dimension_semantics = [], scalar_prefetch = 0 : i64, scratch_operands = 0 : i64, tpu.core_type = #tpu.core_type<tc>} {
    %c0 = arith.constant 0 : index
    %c0_0 = arith.constant 0 : index
    %0 = vector.load %arg0[%c0, %c0_0] : memref<16x32xf32, #tpu.memory_space<vmem>>, vector<16x32xf32>
    %c0_1 = arith.constant 0 : index
    %c0_2 = arith.constant 0 : index
    %1 = vector.load %arg1[%c0_1, %c0_2] : memref<16x32xf32, #tpu.memory_space<vmem>>, vector<16x32xf32>
    %cst = arith.constant dense<0.000000e+00> : vector<16x16xf32>
    %2 = tpu.matmul %0, %1, %cst {dimension_numbers = #tpu.dot_dimension_numbers<[1], [1], [0], [0], [0, 0, 1, 0], [], []>} : vector<16x32xf32>, vector<16x32xf32>, vector<16x16xf32> -> vector<16x16xf32>
    %c0_3 = arith.constant 0 : index
    %c0_4 = arith.constant 0 : index
    %3 = vector.load %arg2[%c0_3, %c0_4] : memref<1x16xf32, #tpu.memory_space<vmem>>, vector<1x16xf32>
    %4 = vector.broadcast %3 : vector<1x16xf32> to vector<16x16xf32>
    %5 = arith.addf %2, %4 : vector<16x16xf32>
    %c0_5 = arith.constant 0 : index
    %c0_6 = arith.constant 0 : index
    %6 = vector.load %arg3[%c0_5, %c0_6] : memref<16x16xf32, #tpu.memory_space<vmem>>, vector<16x16xf32>
    tpu.vector_store %arg3[%c0_5, %c0_6], %5 {strides = array<i32>} : memref<16x16xf32, #tpu.memory_space<vmem>>, vector<16x16xf32>,
    return
  }
}

</mosaic_0001>

<bundles_post_ra>
// kernel: subnet_forward.1
= control target key start
LH: loop header
LB: loop body
LE: loop exit
PB: predicated region body
PF: predicated region fallthrough
CT: control target
= control target key end

     0   :  { %8 = vsyncpa [#allocation3], 0  ;;  %s335_s0 = inlined_call_operand.hbm [shape: f32[16,32], index: 0, kind: input, shape index: {}]   ;;  %s336_s1 = inlined_call_operand.hbm [shape: f32[16,32], index: 1, kind: input, shape index: {}]   ;;  %s337_s2 = inlined_call_operand.vmem [shape: f32[1,16], index: 2, kind: input, shape index: {}]   ;;  %s338_s3 = inlined_call_operand.hbm [shape: f32[16,16], index: 3, kind: output, shape index: {}]  }
   0x1   :  { %9 = vsyncpa [#allocation6], 0 }
   0x2   :  { %10 = vsyncpa [#allocation4], 0  ;;  %s262_s12 = smov [#allocation2]   ;;  %s190_s16 = scalar_lea.hbm %s335_s0, 256 }
   0x3   :  { %s16_s13 = sshll.u32 %s262_s12, 4  ;;  %p191_p0 = scmp.ne.s32.totalorder %s335_s0, %s190_s16  ;;  %s17_s13 = int_to_ptr.vmem [resolvable:$true] %s16_s13 }
   0x4   :  { %p194_p1 = scmp.lt.u32.totalorder %s190_s16, %s335_s0 }
   0x6   :  { %p196_p2 = pnand %p194_p1, %p191_p0 }
   0x8   :  { %199 = shalt.err (!%p196_p2)
}
   0x9   :  { %s200_s21 = scalar_lea.vmem %s17_s13, 256  ;;  %p205_p4 = scmp.lt.s32.totalorder %s17_s13, %s17_s13 }
   0xa   :  { %p201_p3 = scmp.ne.s32.totalorder %s17_s13, %s200_s21  ;;  %p206_p5 = scmp.lt.s32.totalorder %s200_s21, %s200_s21 }
   0xc   :  { %p207_p6 = por %p206_p5, %p205_p4 }
   0xe   :  { %p208_p7 = pnand %p207_p6, %p201_p3 }
  0x10   :  { %211 = shalt.err (!%p208_p7)
}
  0x11   :  { %s263_s22 = smov 128   ;;  %s264_s23 = smov 8  }
  0x12   :  { %22 = dma.hbm_to_vmem [thread:$0]  %s335_s0, 256, %s17_s13, [#allocation3], %s263_s22, %s263_s22, %s264_s23  }
  0x13   :  { %s265_s26 = smov [#allocation5]   ;;  %s212_s30 = scalar_lea.hbm %s336_s1, 256 }
  0x14   :  { %s28_s27 = sshll.u32 %s265_s26, 4  ;;  %p213_p8 = scmp.ne.s32.totalorder %s336_s1, %s212_s30  ;;  %s29_s27 = int_to_ptr.vmem [resolvable:$true] %s28_s27 }
  0x15   :  { %p216_p9 = scmp.lt.u32.totalorder %s212_s30, %s336_s1 }
  0x17   :  { %p218_p10 = pnand %p216_p9, %p213_p8 }
  0x19   :  { %221 = shalt.err (!%p218_p10)
}
  0x1a   :  { %s222_s8 = scalar_lea.vmem %s29_s27, 256  ;;  %p227_p12 = scmp.lt.s32.totalorder %s29_s27, %s29_s27 }
  0x1b   :  { %p223_p11 = scmp.ne.s32.totalorder %s29_s27, %s222_s8  ;;  %p228_p13 = scmp.lt.s32.totalorder %s222_s8, %s222_s8 }
  0x1d   :  { %p229_p0 = por %p228_p13, %p227_p12 }
  0x1f   :  { %p230_p1 = pnand %p229_p0, %p223_p11 }
  0x21   :  { %233 = shalt.err (!%p230_p1)
}
  0x22   :  { %34 = dma.hbm_to_vmem [thread:$0]  %s336_s1, 256, %s29_s27, [#allocation6], %s263_s22, %s263_s22, %s264_s23  }
  0x23   :  { %256 = dma.done.wait [#allocation3], 256  }
  0x24   :  { %257 = vsyncadd [#allocation3], 4294967040 }
  0x25   :  { %258 = dma.done.wait [#allocation6], 256  }
  0x26   :  { %259 = vsyncadd [#allocation6], 4294967040  ;;  %vm54_vm0 = vcmask 261120   ;;  %v45_v0 = vld [vmem:[#allocation5] sm:$0xff]  ;;  %v46_v1 = vld [vmem:[#allocation5 + $0x8] sm:$0xff]  ;;  %s266_s1 = smov [#allocation7]  }
  0x27   :  { %vm180_vm1 = vmpackc.low %vm54_vm0, %vm54_vm0  ;;  %v43_v2 = vld [vmem:[#allocation2] sm:$0xff]  ;;  %v179_v3 = vpack.c.bf16 %v46_v1, %v45_v0  ;;  %v44_v4 = vld [vmem:[#allocation2 + $0x8] sm:$0xff]  ;;  %s150_s12 = sshll.u32 %s266_s1, 4  ;;  %vm142_vm2 = vcmask 130048   ;;  %s151_s12 = int_to_ptr.vmem [resolvable:$true] %s150_s12 }
  0x28   :  { %176 = vmatprep.mubr.msk.f32.mxu0 %vm54_vm0, %v43_v2  ;;  %v163_v5 = vld [vmem:[%s337_s2] ss:$0 sm:$0xff]  ;;  %s234_s13 = scalar_lea.vmem %s151_s12, 256  ;;  %p239_p3 = scmp.lt.s32.totalorder %s151_s12, %s151_s12 }
  0x29   :  { %181 = vmatprep.subr.msk.bf16.mxu0 %vm180_vm1, %v179_v3  ;;  %p235_p2 = scmp.ne.s32.totalorder %s151_s12, %s234_s13  ;;  %p240_p4 = scmp.lt.s32.totalorder %s234_s13, %s234_s13 }
  0x2a   :  { %184 = vmatpush3.bf16.xpose.msk.msra.mxu0 %vm180_vm1, %v179_v3 }
  0x2b   :  { %p241_p5 = por %p240_p4, %p239_p3 }
  0x2d   :  { %p242_p6 = pnand %p241_p5, %p235_p2 }
  0x31   :  { %177 = vmatmul.mubr.msk.f32.vlgmr.msra.gmra.mrb[0].mxu0 %vm54_vm0, %v44_v4 }
 0x104   :  { %v178_v6 = vpop.f32.mrb[0].mxu0 }
 0x105   :  { %v139_v7 = vadd.f32 %v178_v6, %v163_v5  ;;  %v133_v8 = vpop.f32.mrb[1].mxu0 }
 0x106   :  { %v134_v9 = vadd.f32 %v163_v5, %v133_v8 }
 0x107   :  { %144 = vst.msk [vmem:[#allocation7 + $0x8] sm:$0xff] %vm142_vm2, %v139_v7 }
 0x108   :  { %143 = vst.msk [vmem:[#allocation7] sm:$0xff] %vm142_vm2, %v134_v9 }
 0x109   :  { %245 = shalt.err (!%p242_p6)
}
 0x10a   :  { %s246_s2 = scalar_lea.hbm %s338_s3, 256 }
 0x10b   :  { %p247_p7 = scmp.ne.s32.totalorder %s338_s3, %s246_s2  ;;  %p250_p8 = scmp.lt.u32.totalorder %s246_s2, %s338_s3 }
 0x10d   :  { %p252_p9 = pnand %p250_p8, %p247_p7 }
 0x10f   :  { %255 = shalt.err (!%p252_p9)
}
 0x110   :  { %156 = dma.vmem_to_hbm [thread:$0]  %s151_s12, 256, %s338_s3, [#allocation4], %s263_s22, %s263_s22, %s264_s23  }
 0x111   :  { %260 = dma.done.wait [#allocation4], 256  }
 0x112   :  { %261 = vsyncadd [#allocation4], 4294967040 }
 0x113   :  { %160 = vsyncpa [#allocation3], 1 }
 0x114   :  { %161 = vsyncpa [#allocation6], 1 }
 0x115   :  { %162 = vsyncpa [#allocation4], 1 }

</bundles_post_ra>
